<compile_context>
chip_gen: v7x
topology: tpu7x:2x2x1
jax: 0.10.0
libtpu: 0.0.40
codegen_flags: <defaults>
</compile_context>

<pallas_src>
import functools

import jax
import jax.numpy as jnp
from jax.experimental import pallas as pl
from jax.experimental.pallas import tpu as pltpu


def _round_up(v, m):
    return (v + m - 1) // m * m


def _linear_bn_relu_kernel(x_ref, w_ref, scale_ref, shift_ref, o_ref, acc_ref):
    """One (tm, tn) output tile; K-contraction runs over grid axis 2."""
    k = pl.program_id(2)

    @pl.when(k == 0)
    def _():
        acc_ref[...] = jnp.zeros_like(acc_ref)

    # MXU matmul with f32 accumulation (default precision -> single-pass).
    acc_ref[...] += jnp.dot(x_ref[...], w_ref[...],
                            preferred_element_type=jnp.float32)

    @pl.when(k == pl.num_programs(2) - 1)
    def _():
        # Fused BatchNorm (folded affine) + bias + ReLU epilogue on the VPU.
        y = acc_ref[...] * scale_ref[...] + shift_ref[...]
        o_ref[...] = jnp.maximum(y, 0.0).astype(o_ref.dtype)


def linear_unit(x, params, *, batchnorm=True, eps=1e-5,
                tile_m=256, tile_n=256, tile_k=512):
    """Fused forward of LinearUnit.  x: (B, in_features) -> (B, out_features)."""
    B, in_f = x.shape
    W = params["weight"].astype(jnp.float32)          # (out_f, in_f)   torch layout
    b = params["bias"].astype(jnp.float32)            # (out_f,)
    out_f = W.shape[0]

    # Fold BatchNorm1d (eval-mode running stats) + linear bias into (scale, shift).
    if batchnorm:
        gamma = params["gamma"].astype(jnp.float32)
        beta = params["beta"].astype(jnp.float32)
        mean = params["running_mean"].astype(jnp.float32)
        var = params["running_var"].astype(jnp.float32)
        scale = gamma / jnp.sqrt(var + eps)            # (out_f,)
        shift = (b - mean) * scale + beta              # (out_f,)
    else:
        scale = jnp.ones((out_f,), jnp.float32)
        shift = b

    # Pad everything to (8, 128)-aligned shapes for lane-dense, MXU-friendly tiles.
    M_pad = _round_up(B, 8)
    K_pad = _round_up(in_f, 128)
    N_pad = _round_up(out_f, 128)

    x_p = jnp.zeros((M_pad, K_pad), jnp.float32).at[:B, :in_f].set(
        x.astype(jnp.float32))
    w_t = jnp.zeros((K_pad, N_pad), jnp.float32).at[:in_f, :out_f].set(W.T)
    scale_row = jnp.zeros((1, N_pad), jnp.float32).at[0, :out_f].set(scale)
    shift_row = jnp.zeros((1, N_pad), jnp.float32).at[0, :out_f].set(shift)

    tm = min(tile_m, M_pad)
    tn = min(tile_n, N_pad)
    tk = min(tile_k, K_pad)
    grid = (M_pad // tm, N_pad // tn, K_pad // tk)

    out = pl.pallas_call(
        _linear_bn_relu_kernel,
        out_shape=jax.ShapeDtypeStruct((M_pad, N_pad), jnp.float32),
        grid_spec=pltpu.PrefetchScalarGridSpec(
            num_scalar_prefetch=0,
            grid=grid,
            in_specs=[
                pl.BlockSpec((tm, tk), lambda i, j, k: (i, k)),   # x
                pl.BlockSpec((tk, tn), lambda i, j, k: (k, j)),   # W^T
                pl.BlockSpec((1, tn), lambda i, j, k: (0, j)),    # scale
                pl.BlockSpec((1, tn), lambda i, j, k: (0, j)),    # shift
            ],
            out_specs=pl.BlockSpec((tm, tn), lambda i, j, k: (i, j)),
            scratch_shapes=[pltpu.VMEM((tm, tn), jnp.float32)],
        ),
        compiler_params=pltpu.CompilerParams(
            dimension_semantics=("parallel", "parallel", "arbitrary")),
    )(x_p, w_t, scale_row, shift_row)

    return out[:B, :out_f]


def reference_linear_unit(x, params, *, batchnorm=True, eps=1e-5):
    """Pure-JAX reference mirroring nn.Linear -> nn.BatchNorm1d(eval) -> nn.ReLU."""
    z = x.astype(jnp.float32) @ params["weight"].T.astype(jnp.float32) \
        + params["bias"].astype(jnp.float32)
    if batchnorm:
        z = (z - params["running_mean"]) / jnp.sqrt(params["running_var"] + eps)
        z = z * params["gamma"] + params["beta"]
    return jax.nn.relu(z)


def init_params(key, *, in_features, out_features):
    """Deterministic synthetic init matching the PyTorch module's parameter shapes."""
    k_w, k_b, k_g, k_be, k_m, k_v = jax.random.split(key, 6)
    bound = 1.0 / (in_features ** 0.5)
    weight = jax.random.uniform(k_w, (out_features, in_features),
                                jnp.float32, -bound, bound)
    bias = jax.random.uniform(k_b, (out_features,), jnp.float32, -bound, bound)
    gamma = 1.0 + 0.1 * jax.random.normal(k_g, (out_features,), jnp.float32)
    beta = 0.1 * jax.random.normal(k_be, (out_features,), jnp.float32)
    running_mean = 0.1 * jax.random.normal(k_m, (out_features,), jnp.float32)
    running_var = jnp.abs(1.0 + 0.1 * jax.random.normal(k_v, (out_features,),
                                                        jnp.float32))
    return {"weight": weight, "bias": bias, "gamma": gamma, "beta": beta,
            "running_mean": running_mean, "running_var": running_var}


if __name__ == "__main__":
    key = jax.random.PRNGKey(0)
    k_x, k_p = jax.random.split(key)

    B, IN_F, OUT_F = 8, 16, 32
    x = jax.random.normal(k_x, (B, IN_F), jnp.float32)
    params = init_params(k_p, in_features=IN_F, out_features=OUT_F)

    # With BatchNorm (eval-mode running stats).
    out_bn = jax.block_until_ready(linear_unit(x, params, batchnorm=True))
    ref_bn = jax.block_until_ready(
        reference_linear_unit(x, params, batchnorm=True))
    assert out_bn.shape == (B, OUT_F), out_bn.shape
    assert jnp.allclose(out_bn, ref_bn, rtol=1e-4, atol=1e-4), \
        float(jnp.max(jnp.abs(out_bn - ref_bn)))

    # Without BatchNorm.
    out_nb = jax.block_until_ready(linear_unit(x, params, batchnorm=False))
    ref_nb = jax.block_until_ready(
        reference_linear_unit(x, params, batchnorm=False))
    assert jnp.allclose(out_nb, ref_nb, rtol=1e-4, atol=1e-4), \
        float(jnp.max(jnp.abs(out_nb - ref_nb)))

    print("KERNEL_OK")
</pallas_src>

<mosaic_0001>
module attributes {stable_mosaic.version = 11 : i64} {
  func.func @_linear_bn_relu_kernel(%arg0: i32, %arg1: i32, %arg2: i32, %arg3: memref<8x128xf32, #tpu.memory_space<vmem>>, %arg4: memref<128x128xf32, #tpu.memory_space<vmem>>, %arg5: memref<1x128xf32, #tpu.memory_space<vmem>>, %arg6: memref<1x128xf32, #tpu.memory_space<vmem>>, %arg7: memref<8x128xf32, #tpu.memory_space<vmem>>, %arg8: memref<8x128xf32, #tpu.memory_space<vmem>>) attributes {dimension_semantics = [#tpu.dimension_semantics<parallel>, #tpu.dimension_semantics<parallel>, #tpu.dimension_semantics<arbitrary>], iteration_bounds = array<i64: 1, 1, 1>, scalar_prefetch = 0 : i64, scratch_operands = 1 : i64, tpu.core_type = #tpu.core_type<tc>, window_params = [{transform_indices = @transform_0, window_bounds = array<i64: 8, 128>}, {transform_indices = @transform_1, window_bounds = array<i64: 128, 128>}, {transform_indices = @transform_2, window_bounds = array<i64: 1, 128>}, {transform_indices = @transform_3, window_bounds = array<i64: 1, 128>}, {transform_indices = @transform_4, window_bounds = array<i64: 8, 128>}]} {
    %c0_i32 = arith.constant 0 : i32
    %0 = arith.cmpi eq, %arg2, %c0_i32 : i32
    %1 = arith.extui %0 : i1 to i32
    %c0_i32_0 = arith.constant 0 : i32
    %2 = arith.cmpi ne, %1, %c0_i32_0 : i32
    scf.if %2 {
      %cst_10 = arith.constant 0.000000e+00 : f32
      %12 = vector.broadcast %cst_10 : f32 to vector<8x128xf32>
      %c0_11 = arith.constant 0 : index
      %c0_12 = arith.constant 0 : index
      %13 = vector.load %arg8[%c0_11, %c0_12] : memref<8x128xf32, #tpu.memory_space<vmem>>, vector<8x128xf32>
      tpu.vector_store %arg8[%c0_11, %c0_12], %12 {strides = array<i32>} : memref<8x128xf32, #tpu.memory_space<vmem>>, vector<8x128xf32>,
    } else {
    }
    %c0 = arith.constant 0 : index
    %c0_1 = arith.constant 0 : index
    %3 = vector.load %arg8[%c0, %c0_1] : memref<8x128xf32, #tpu.memory_space<vmem>>, vector<8x128xf32>
    %c0_2 = arith.constant 0 : index
    %c0_3 = arith.constant 0 : index
    %4 = vector.load %arg3[%c0_2, %c0_3] : memref<8x128xf32, #tpu.memory_space<vmem>>, vector<8x128xf32>
    %c0_4 = arith.constant 0 : index
    %c0_5 = arith.constant 0 : index
    %5 = vector.load %arg4[%c0_4, %c0_5] : memref<128x128xf32, #tpu.memory_space<vmem>>, vector<128x128xf32>
    %cst = arith.constant dense<0.000000e+00> : vector<8x128xf32>
    %6 = tpu.matmul %4, %5, %cst {dimension_numbers = #tpu.dot_dimension_numbers<[1], [0], [0], [1], [0, 0, 1, 1], [], []>} : vector<8x128xf32>, vector<128x128xf32>, vector<8x128xf32> -> vector<8x128xf32>
    %7 = arith.addf %3, %6 : vector<8x128xf32>
    %c0_6 = arith.constant 0 : index
    %c0_7 = arith.constant 0 : index
    %8 = vector.load %arg8[%c0_6, %c0_7] : memref<8x128xf32, #tpu.memory_space<vmem>>, vector<8x128xf32>
    tpu.vector_store %arg8[%c0_6, %c0_7], %7 {strides = array<i32>} : memref<8x128xf32, #tpu.memory_space<vmem>>, vector<8x128xf32>,
    %c0_i32_8 = arith.constant 0 : i32
    %9 = arith.cmpi eq, %arg2, %c0_i32_8 : i32
    %10 = arith.extui %9 : i1 to i32
    %c0_i32_9 = arith.constant 0 : i32
    %11 = arith.cmpi ne, %10, %c0_i32_9 : i32
    scf.if %11 {
      %c0_10 = arith.constant 0 : index
      %c0_11 = arith.constant 0 : index
      %12 = vector.load %arg8[%c0_10, %c0_11] : memref<8x128xf32, #tpu.memory_space<vmem>>, vector<8x128xf32>
      %c0_12 = arith.constant 0 : index
      %c0_13 = arith.constant 0 : index
      %13 = vector.load %arg5[%c0_12, %c0_13] : memref<1x128xf32, #tpu.memory_space<vmem>>, vector<1x128xf32>
      %14 = vector.broadcast %13 : vector<1x128xf32> to vector<8x128xf32>
      %15 = arith.mulf %12, %14 : vector<8x128xf32>
      %c0_14 = arith.constant 0 : index
      %c0_15 = arith.constant 0 : index
      %16 = vector.load %arg6[%c0_14, %c0_15] : memref<1x128xf32, #tpu.memory_space<vmem>>, vector<1x128xf32>
      %17 = vector.broadcast %16 : vector<1x128xf32> to vector<8x128xf32>
      %18 = arith.addf %15, %17 : vector<8x128xf32>
      %cst_16 = arith.constant 0.000000e+00 : f32
      %19 = vector.broadcast %cst_16 : f32 to vector<8x128xf32>
      %20 = arith.maximumf %18, %19 : vector<8x128xf32>
      %c0_17 = arith.constant 0 : index
      %c0_18 = arith.constant 0 : index
      %21 = vector.load %arg7[%c0_17, %c0_18] : memref<8x128xf32, #tpu.memory_space<vmem>>, vector<8x128xf32>
      tpu.vector_store %arg7[%c0_17, %c0_18], %20 {strides = array<i32>} : memref<8x128xf32, #tpu.memory_space<vmem>>, vector<8x128xf32>,
    } else {
    }
    return
  }
  func.func @transform_0(%arg0: i32, %arg1: i32, %arg2: i32) -> (i32, i32) {
    %c0_i32 = arith.constant 0 : i32
    return %arg0, %arg2 : i32, i32
  }
  func.func @transform_1(%arg0: i32, %arg1: i32, %arg2: i32) -> (i32, i32) {
    %c0_i32 = arith.constant 0 : i32
    return %arg2, %arg1 : i32, i32
  }
  func.func @transform_2(%arg0: i32, %arg1: i32, %arg2: i32) -> (i32, i32) {
    %c0_i32 = arith.constant 0 : i32
    %c0_i32_0 = arith.constant 0 : i32
    return %c0_i32, %arg1 : i32, i32
  }
  func.func @transform_3(%arg0: i32, %arg1: i32, %arg2: i32) -> (i32, i32) {
    %c0_i32 = arith.constant 0 : i32
    %c0_i32_0 = arith.constant 0 : i32
    return %c0_i32, %arg1 : i32, i32
  }
  func.func @transform_4(%arg0: i32, %arg1: i32, %arg2: i32) -> (i32, i32) {
    %c0_i32 = arith.constant 0 : i32
    return %arg0, %arg1 : i32, i32
  }
}

</mosaic_0001>

<bundles_post_ra>
// kernel: tpu_custom_call.1
= control target key start
LH: loop header
LB: loop body
LE: loop exit
PB: predicated region body
PF: predicated region fallthrough
CT: control target
= control target key end

     0   :  { %9 = vsyncpa [#allocation4], 0  ;;  %s417_s0 = inlined_call_operand.hbm [shape: f32[8,128], index: 0, kind: input, shape index: {}]   ;;  %s418_s1 = inlined_call_operand.hbm [shape: f32[128,128], index: 1, kind: input, shape index: {}]   ;;  %s419_s2 = inlined_call_operand.vmem [shape: f32[1,128], index: 2, kind: input, shape index: {}]   ;;  %s420_s3 = inlined_call_operand.vmem [shape: f32[1,128], index: 3, kind: input, shape index: {}]   ;;  %s421_s4 = inlined_call_operand.hbm [shape: f32[8,128], index: 4, kind: output, shape index: {}]  }
   0x1   :  { %10 = vsyncpa [#allocation7], 0 }
   0x2   :  { %11 = vsyncpa [#allocation5], 0  ;;  %s335_s15 = smov [#allocation3]   ;;  %s336_s17 = smov [#allocation6]  }
   0x3   :  { %s18_s16 = sshll.u32 %s335_s15, 4  ;;  %s27_s18 = sshll.u32 %s336_s17, 4  ;;  %s19_s16 = int_to_ptr.vmem [resolvable:$true] %s18_s16  ;;  %s368_s18 = int_to_ptr.vmem [resolvable:$true] %s27_s18 }
   0x4   :  { %s263_s21 = scalar_lea.hbm %s417_s0, 128 }
   0x5   :  { %p264_p0 = scmp.ne.s32.totalorder %s417_s0, %s263_s21  ;;  %p267_p1 = scmp.lt.u32.totalorder %s263_s21, %s417_s0 }
   0x7   :  { %p269_p2 = pnand %p267_p1, %p264_p0 }
   0x9   :  { %272 = shalt.err (!%p269_p2)
}
   0xa   :  { %s273_s26 = scalar_lea.vmem %s19_s16, 128  ;;  %p278_p4 = scmp.lt.s32.totalorder %s19_s16, %s19_s16 }
   0xb   :  { %p274_p3 = scmp.ne.s32.totalorder %s19_s16, %s273_s26  ;;  %p279_p5 = scmp.lt.s32.totalorder %s273_s26, %s273_s26 }
   0xd   :  { %p280_p6 = por %p279_p5, %p278_p4 }
   0xf   :  { %p281_p7 = pnand %p280_p6, %p274_p3 }
  0x11   :  { %284 = shalt.err (!%p281_p7)
}
  0x12   :  { %21 = dma.hbm_to_vmem [thread:$0]  %s417_s0, 128, %s19_s16, [#allocation4]  }
  0x13   :  { %s285_s5 = scalar_lea.hbm %s418_s1, 2048 }
  0x14   :  { %p286_p8 = scmp.ne.s32.totalorder %s418_s1, %s285_s5  ;;  %p289_p9 = scmp.lt.u32.totalorder %s285_s5, %s418_s1 }
  0x16   :  { %p291_p10 = pnand %p289_p9, %p286_p8 }
  0x18   :  { %294 = shalt.err (!%p291_p10)
}
  0x19   :  { %s295_s10 = scalar_lea.vmem %s368_s18, 2048  ;;  %p300_p12 = scmp.lt.s32.totalorder %s368_s18, %s368_s18 }
  0x1a   :  { %p296_p11 = scmp.ne.s32.totalorder %s368_s18, %s295_s10  ;;  %p301_p13 = scmp.lt.s32.totalorder %s295_s10, %s295_s10 }
  0x1c   :  { %p302_p0 = por %p301_p13, %p300_p12 }
  0x1e   :  { %p303_p1 = pnand %p302_p0, %p296_p11 }
  0x20   :  { %306 = shalt.err (!%p303_p1)
}
  0x21   :  { %s337_s0 = smov 128   ;;  %s338_s11 = smov 8  }
  0x22   :  { %33 = dma.hbm_to_vmem [thread:$0]  %s418_s1, 2048, %s368_s18, [#allocation7], %s337_s0, %s337_s0, %s338_s11  }
  0x23   :  { %329 = dma.done.wait [#allocation4], 128  }
  0x24   :  { %330 = vsyncadd [#allocation4], 4294967168 }
  0x25   :  { %331 = dma.done.wait [#allocation7], 2048  }
  0x26   :  { %332 = vsyncadd [#allocation7], 4294965248  ;;  %v339_v0 = vmov 0.0|0.0   ;;  %vm340_vm0 = vmmov 0   ;;  %v341_v1 = vmov 0.0   ;;  %v51_v2 = vld [vmem:[#allocation6] sm:$0xff] }
  0x27   :  { %231 = vmatprep.subr.bf16.mxu0 %v339_v0  ;;  %228 = vmatprep.mubr.msk.f32.mxu0 %vm340_vm0, %v341_v1  ;;  %v52_v3 = vld [vmem:[#allocation6 + $0x8] sm:$0xff]  ;;  %v53_v4 = vld [vmem:[#allocation6 + $0x10] sm:$0xff]  ;;  %v54_v6 = vld [vmem:[#allocation6 + $0x18] sm:$0xff]  ;;  %s342_s17 = smov [#allocation8]  }
  0x28   :  { %v232_v5 = vpack.c.bf16 %v52_v3, %v51_v2  ;;  %v235_v7 = vpack.c.bf16 %v54_v6, %v53_v4  ;;  %v55_v8 = vld [vmem:[#allocation6 + $0x20] sm:$0xff]  ;;  %v56_v9 = vld [vmem:[#allocation6 + $0x28] sm:$0xff]  ;;  %v57_v11 = vld [vmem:[#allocation6 + $0x30] sm:$0xff]  ;;  %s167_s18 = sshll.u32 %s342_s17, 4  ;;  %s168_s18 = int_to_ptr.vmem [resolvable:$true] %s167_s18 }
  0x29   :  { %v238_v10 = vpack.c.bf16 %v56_v9, %v55_v8  ;;  %v58_v12 = vld [vmem:[#allocation6 + $0x38] sm:$0xff]  ;;  %v59_v14 = vld [vmem:[#allocation6 + $0x40] sm:$0xff]  ;;  %v60_v15 = vld [vmem:[#allocation6 + $0x48] sm:$0xff]  ;;  %s307_s19 = scalar_lea.vmem %s168_s18, 128  ;;  %p312_p3 = scmp.lt.s32.totalorder %s168_s18, %s168_s18 }
  0x2a   :  { %233 = vmatpush3.bf16.msra.mxu0 %v232_v5  ;;  %v241_v13 = vpack.c.bf16 %v58_v12, %v57_v11  ;;  %v244_v16 = vpack.c.bf16 %v60_v15, %v59_v14  ;;  %v61_v17 = vld [vmem:[#allocation6 + $0x50] sm:$0xff]  ;;  %v62_v18 = vld [vmem:[#allocation6 + $0x58] sm:$0xff]  ;;  %v63_v20 = vld [vmem:[#allocation6 + $0x60] sm:$0xff]  ;;  %p308_p2 = scmp.ne.s32.totalorder %s168_s18, %s307_s19  ;;  %p313_p4 = scmp.lt.s32.totalorder %s307_s19, %s307_s19 }
  0x2b   :  { %234 = vmatprep.subr.bf16.mxu0 %v339_v0  ;;  %v247_v19 = vpack.c.bf16 %v62_v18, %v61_v17  ;;  %v64_v21 = vld [vmem:[#allocation6 + $0x68] sm:$0xff]  ;;  %v65_v23 = vld [vmem:[#allocation6 + $0x70] sm:$0xff]  ;;  %v66_v24 = vld [vmem:[#allocation6 + $0x78] sm:$0xff] }
  0x2c   :  { %v250_v22 = vpack.c.bf16 %v64_v21, %v63_v20  ;;  %v253_v25 = vpack.c.bf16 %v66_v24, %v65_v23  ;;  %v50_v26 = vld [vmem:[#allocation3] sm:$0xff]  ;;  %p314_p5 = por %p313_p4, %p312_p3 }
  0x2d   :  { %v177_v27 = vld [vmem:[%s419_s2] ss:$0 sm:$0xff] }
  0x2e   :  { %236 = vmatpush3.bf16.msra.mxu0 %v235_v7  ;;  %v178_v29 = vld [vmem:[%s420_s3] ss:$0 sm:$0xff]  ;;  %p315_p6 = pnand %p314_p5, %p308_p2 }
  0x2f   :  { %237 = vmatprep.subr.bf16.mxu0 %v339_v0 }
  0x32   :  { %239 = vmatpush3.bf16.msra.mxu0 %v238_v10 }
  0x33   :  { %240 = vmatprep.subr.bf16.mxu0 %v339_v0 }
  0x36   :  { %242 = vmatpush3.bf16.msra.mxu0 %v241_v13 }
  0x37   :  { %243 = vmatprep.subr.bf16.mxu0 %v339_v0 }
  0x3a   :  { %245 = vmatpush3.bf16.msra.mxu0 %v244_v16 }
  0x3b   :  { %246 = vmatprep.subr.bf16.mxu0 %v339_v0 }
  0x3e   :  { %248 = vmatpush3.bf16.msra.mxu0 %v247_v19 }
  0x3f   :  { %249 = vmatprep.subr.bf16.mxu0 %v339_v0 }
  0x42   :  { %251 = vmatpush3.bf16.msra.mxu0 %v250_v22 }
  0x43   :  { %252 = vmatprep.subr.bf16.mxu0 %v339_v0 }
  0x46   :  { %254 = vmatpush3.bf16.msra.mxu0 %v253_v25 }
  0x49   :  { %229 = vmatmul.mubr.f32.vlgmr.msra.gmra.mrb[0].mxu0 %v50_v26 }
 0x11c   :  { %v133_v28 = vpop.f32.mrb[0].mxu0 }
 0x11d   :  { %v150_v30 = vmul.f32 %v177_v27, %v133_v28  ;;  %v230_v31 = vpop.f32.mrb[1].mxu0 }
 0x11f   :  { %v158_v32 = vadd.f32 %v178_v29, %v150_v30 }
 0x121   :  { %v159_v33 = vmax.f32 %v158_v32, 0.0 }
 0x123   :  { %160 = vst [vmem:[#allocation8] sm:$0xff] %v159_v33 }
 0x124   :  { %318 = shalt.err (!%p315_p6)
}
 0x125   :  { %s319_s21 = scalar_lea.hbm %s421_s4, 128 }
 0x126   :  { %p320_p7 = scmp.ne.s32.totalorder %s421_s4, %s319_s21  ;;  %p323_p8 = scmp.lt.u32.totalorder %s319_s21, %s421_s4 }
 0x128   :  { %p325_p9 = pnand %p323_p8, %p320_p7 }
 0x12a   :  { %328 = shalt.err (!%p325_p9)
}
 0x12b   :  { %170 = dma.vmem_to_hbm [thread:$0]  %s168_s18, 128, %s421_s4, [#allocation5]  }
 0x12c   :  { %333 = dma.done.wait [#allocation5], 128  }
 0x12d   :  { %334 = vsyncadd [#allocation5], 4294967168 }
 0x12e   :  { %174 = vsyncpa [#allocation4], 1 }
 0x12f   :  { %175 = vsyncpa [#allocation7], 1 }
 0x130   :  { %176 = vsyncpa [#allocation5], 1 }

</bundles_post_ra>
